<compile_context>
chip_gen: v7x
topology: tpu7x:2x2x1
jax: 0.10.0
libtpu: 0.0.40
codegen_flags: <defaults>
</compile_context>

<pallas_src>
import jax
import jax.numpy as jnp
from jax.experimental import pallas as pl
from jax.experimental.pallas import tpu as pltpu


def _linear_sum_kernel(x_ref, w_ref, b_ref, o_ref):
    # x_ref: (B, IN) f32
    # w_ref: (IN, OUT) f32   -- already transposed in the wrapper
    # b_ref: (1, OUT) f32
    # o_ref: (1, 1)  f32     -- scalar result of the full-tensor sum
    y = jnp.dot(x_ref[...], w_ref[...], preferred_element_type=jnp.float32) + b_ref[...]
    o_ref[...] = jnp.sum(y, keepdims=True)


def linear_sum_pallas(x, w, b):
    """x: (B, IN) f32, w: (OUT, IN) f32 (torch.nn.Linear layout), b: (OUT,) f32.

    Returns the scalar sum of the linear layer output: sum(x @ w.T + b).
    """
    B, IN = x.shape
    OUT = w.shape[0]
    w_t = w.T                 # (IN, OUT): transpose once in the wrapper (free layout plumbing)
    b2 = b.reshape(1, OUT)    # keep 2-D for a TPU-friendly layout

    out = pl.pallas_call(
        _linear_sum_kernel,
        out_shape=jax.ShapeDtypeStruct((1, 1), jnp.float32),
        in_specs=[
            pl.BlockSpec(memory_space=pltpu.MemorySpace.VMEM),   # x  (full array)
            pl.BlockSpec(memory_space=pltpu.MemorySpace.VMEM),   # w^T (full array)
            pl.BlockSpec(memory_space=pltpu.MemorySpace.VMEM),   # bias (full array)
        ],
        out_specs=pl.BlockSpec(memory_space=pltpu.MemorySpace.VMEM),
    )(x, w_t, b2)
    return out[0, 0]


if __name__ == "__main__":
    key = jax.random.PRNGKey(0)
    kx, kw, kb = jax.random.split(key, 3)

    B, IN, OUT = 2, 8, 8
    x = jax.random.normal(kx, (B, IN), dtype=jnp.float32)
    # Deterministic parameter init mimicking torch.nn.Linear's uniform(-1/sqrt(in), 1/sqrt(in))
    bound = 1.0 / jnp.sqrt(jnp.float32(IN))
    w = jax.random.uniform(kw, (OUT, IN), minval=-bound, maxval=bound, dtype=jnp.float32)
    b = jax.random.uniform(kb, (OUT,), minval=-bound, maxval=bound, dtype=jnp.float32)

    y = linear_sum_pallas(x, w, b)
    jax.block_until_ready(y)

    # Correctness check against plain JAX reference (matches torch: sum(linear(x))).
    y_ref = jnp.sum(x @ w.T + b)
    assert y.shape == ()
    assert jnp.allclose(y, y_ref, atol=1e-5, rtol=1e-5)

    print("KERNEL_OK")
</pallas_src>

<mosaic_0001>
module attributes {stable_mosaic.version = 11 : i64} {
  func.func @_linear_sum_kernel(%arg0: memref<2x8xf32, #tpu.memory_space<vmem>>, %arg1: memref<8x8xf32, #tpu.memory_space<vmem>>, %arg2: memref<1x8xf32, #tpu.memory_space<vmem>>, %arg3: memref<1x1xf32, #tpu.memory_space<vmem>>) attributes {dimension_semantics = [], scalar_prefetch = 0 : i64, scratch_operands = 0 : i64, tpu.core_type = #tpu.core_type<tc>} {
    %c0 = arith.constant 0 : index
    %c0_0 = arith.constant 0 : index
    %0 = vector.load %arg0[%c0, %c0_0] : memref<2x8xf32, #tpu.memory_space<vmem>>, vector<2x8xf32>
    %c0_1 = arith.constant 0 : index
    %c0_2 = arith.constant 0 : index
    %1 = vector.load %arg1[%c0_1, %c0_2] : memref<8x8xf32, #tpu.memory_space<vmem>>, vector<8x8xf32>
    %cst = arith.constant dense<0.000000e+00> : vector<2x8xf32>
    %2 = tpu.matmul %0, %1, %cst {dimension_numbers = #tpu.dot_dimension_numbers<[1], [0], [0], [1], [0, 0, 1, 1], [], []>} : vector<2x8xf32>, vector<8x8xf32>, vector<2x8xf32> -> vector<2x8xf32>
    %c0_3 = arith.constant 0 : index
    %c0_4 = arith.constant 0 : index
    %3 = vector.load %arg2[%c0_3, %c0_4] : memref<1x8xf32, #tpu.memory_space<vmem>>, vector<1x8xf32>
    %4 = vector.broadcast %3 : vector<1x8xf32> to vector<2x8xf32>
    %5 = arith.addf %2, %4 : vector<2x8xf32>
    %6 = vector.shape_cast %5 : vector<2x8xf32> to vector<1x2x8xf32>
    %cst_5 = arith.constant dense<0.000000e+00> : vector<1xf32>
    %7 = vector.multi_reduction <add>, %6, %cst_5 [1, 2] : vector<1x2x8xf32> to vector<1xf32>
    %8 = vector.shape_cast %7 : vector<1xf32> to vector<1x1x1xf32>
    %9 = vector.extract %8[0, 0, 0] : f32 from vector<1x1x1xf32>
    %10 = vector.broadcast %9 : f32 to vector<1x1xf32>
    %c0_6 = arith.constant 0 : index
    %c0_7 = arith.constant 0 : index
    %11 = vector.load %arg3[%c0_6, %c0_7] : memref<1x1xf32, #tpu.memory_space<vmem>>, vector<1x1xf32>
    tpu.vector_store %arg3[%c0_6, %c0_7], %10 {strides = array<i32>} : memref<1x1xf32, #tpu.memory_space<vmem>>, vector<1x1xf32>,
    return
  }
}

</mosaic_0001>

<bundles_post_ra>
// kernel: tpu_custom_call.1
= control target key start
LH: loop header
LB: loop body
LE: loop exit
PB: predicated region body
PF: predicated region fallthrough
CT: control target
= control target key end

     0   :  { %8 = vsyncpa [#allocation3], 0  ;;  %s304_s0 = inlined_call_operand.hbm [shape: f32[2,8], index: 0, kind: input, shape index: {}]   ;;  %s305_s1 = inlined_call_operand.hbm [shape: f32[8,8], index: 1, kind: input, shape index: {}]   ;;  %s306_s2 = inlined_call_operand.vmem [shape: f32[1,8], index: 2, kind: input, shape index: {}]   ;;  %s307_s3 = inlined_call_operand.hbm [shape: f32[1,1], index: 3, kind: output, shape index: {}]  }
   0x1   :  { %9 = vsyncpa [#allocation6], 0 }
   0x2   :  { %10 = vsyncpa [#allocation4], 0  ;;  %s240_s12 = smov [#allocation2]   ;;  %s241_s14 = smov [#allocation5]  }
   0x3   :  { %s17_s13 = sshll.u32 %s240_s12, 4  ;;  %s27_s15 = sshll.u32 %s241_s14, 4  ;;  %s18_s13 = int_to_ptr.vmem [resolvable:$true] %s17_s13  ;;  %s28_s15 = int_to_ptr.vmem [resolvable:$true] %s27_s15 }
   0x4   :  { %s168_s18 = scalar_lea.hbm %s304_s0, 32 }
   0x5   :  { %p169_p0 = scmp.ne.s32.totalorder %s304_s0, %s168_s18  ;;  %p172_p1 = scmp.lt.u32.totalorder %s168_s18, %s304_s0 }
   0x7   :  { %p174_p2 = pnand %p172_p1, %p169_p0 }
   0x9   :  { %177 = shalt.err (!%p174_p2)
}
   0xa   :  { %s178_s23 = scalar_lea.vmem %s18_s13, 32  ;;  %p183_p4 = scmp.lt.s32.totalorder %s18_s13, %s18_s13 }
   0xb   :  { %p179_p3 = scmp.ne.s32.totalorder %s18_s13, %s178_s23  ;;  %p184_p5 = scmp.lt.s32.totalorder %s178_s23, %s178_s23 }
   0xd   :  { %p185_p6 = por %p184_p5, %p183_p4 }
   0xf   :  { %p186_p7 = pnand %p185_p6, %p179_p3 }
  0x11   :  { %189 = shalt.err (!%p186_p7)
}
  0x12   :  { %20 = dma.hbm_to_vmem [thread:$0]  %s304_s0, 32, %s18_s13, [#allocation3]  }
  0x13   :  { %s190_s28 = scalar_lea.hbm %s305_s1, 128 }
  0x14   :  { %p191_p8 = scmp.ne.s32.totalorder %s305_s1, %s190_s28  ;;  %p194_p9 = scmp.lt.u32.totalorder %s190_s28, %s305_s1 }
  0x16   :  { %p196_p10 = pnand %p194_p9, %p191_p8 }
  0x18   :  { %199 = shalt.err (!%p196_p10)
}
  0x19   :  { %s200_s6 = scalar_lea.vmem %s28_s15, 128  ;;  %p205_p12 = scmp.lt.s32.totalorder %s28_s15, %s28_s15 }
  0x1a   :  { %p201_p11 = scmp.ne.s32.totalorder %s28_s15, %s200_s6  ;;  %p206_p13 = scmp.lt.s32.totalorder %s200_s6, %s200_s6 }
  0x1c   :  { %p207_p0 = por %p206_p13, %p205_p12 }
  0x1e   :  { %p208_p1 = pnand %p207_p0, %p201_p11 }
  0x20   :  { %211 = shalt.err (!%p208_p1)
}
  0x21   :  { %30 = dma.hbm_to_vmem [thread:$0]  %s305_s1, 128, %s28_s15, [#allocation6]  }
  0x22   :  { %234 = dma.done.wait [#allocation3], 32  }
  0x23   :  { %235 = vsyncadd [#allocation3], 4294967264 }
  0x24   :  { %236 = dma.done.wait [#allocation6], 128  }
  0x25   :  { %237 = vsyncadd [#allocation6], 4294967168  ;;  %v242_v0 = vmov 0.0   ;;  %vm243_vm0 = vmmov 0   ;;  %vm48_vm1 = vcmask 64512   ;;  %v40_v1 = vld [vmem:[#allocation5] sm:$0xff] }
  0x26   :  { %156 = vmatprep.subr.mxu0 %v242_v0  ;;  %158 = vmatprep.mubr.msk.f32.mxu0 %vm243_vm0, %v242_v0  ;;  %v39_v2 = vld [vmem:[#allocation2] sm:$0x3]  ;;  %vm122_vm2 = vcmask 58368   ;;  %s244_s1 = smov [#allocation7]   ;;  %vm134_vm3 = vcmask 0  }
  0x27   :  { %157 = vmatpush3.msra.mxu0 %v40_v1  ;;  %v152_v3 = vld [vmem:[%s306_s2] ss:$0 sm:$0xff]  ;;  %s142_s10 = sshll.u32 %s244_s1, 4  ;;  %s143_s10 = int_to_ptr.vmem [resolvable:$true] %s142_s10 }
  0x28   :  { %159 = vmatmul.mubr.msk.f32.vlgmr.msra.gmra.mrb[0].mxu0 %vm48_vm1, %v39_v2  ;;  %s212_s2 = scalar_lea.vmem %s143_s10, 16  ;;  %s216_s12 = scalar_lea.vmem %s143_s10, 32 }
  0x29   :  { %p213_p2 = scmp.ne.s32.totalorder %s143_s10, %s212_s2  ;;  %p217_p3 = scmp.lt.s32.totalorder %s143_s10, %s143_s10 }
  0x2a   :  { %p218_p4 = scmp.lt.s32.totalorder %s216_s12, %s212_s2 }
  0x2c   :  { %p219_p5 = por %p218_p4, %p217_p3 }
  0x2e   :  { %p220_p6 = pnand %p219_p5, %p213_p2 }
  0xfb   :  { %v118_v4 = vpop.f32.mrb[0].mxu0 }
  0xfc   :  { %v119_v5 = vadd.f32 %v152_v3, %v118_v4  ;;  %v160_v6 = vpop.f32.mrb[1].mxu0 }
  0xfe   :  { %v123_v7 = vsel %vm122_vm2, %v119_v5, 0.0 }
  0xff   :  { %124 = vadd.xlane.f32.xlu0 %v123_v7 }
 0x18c   :  { %v125_v8 = vpop.xlane.xlu0 %124 }
 0x18d   :  { %v126_v9 = vrot.slane %v125_v8, 4 }
 0x18f   :  { %v127_v10 = vadd.f32 %v126_v9, %v125_v8 }
 0x191   :  { %v128_v11 = vrot.slane %v127_v10, 2 }
 0x193   :  { %v129_v12 = vadd.f32 %v128_v11, %v127_v10 }
 0x195   :  { %v130_v13 = vrot.slane %v129_v12, 1 }
 0x197   :  { %v131_v14 = vadd.f32 %v130_v13, %v129_v12 }
 0x199   :  { %161 = vpush %v131_v14 }
 0x1ca   :  { %s162_s11 = spop %161 }
 0x1cb   :  { %v133_v15 = vstv %s162_s11 }
 0x1cc   :  { %135 = vst.msk [vmem:[#allocation7] sm:$0x1] %vm134_vm3, %v133_v15 }
 0x1cd   :  { %223 = shalt.err (!%p220_p6)
}
 0x1ce   :  { %s224_s15 = scalar_lea.hbm %s307_s3, 16 }
 0x1cf   :  { %p225_p7 = scmp.ne.s32.totalorder %s307_s3, %s224_s15  ;;  %p228_p8 = scmp.lt.u32.totalorder %s224_s15, %s307_s3 }
 0x1d1   :  { %p230_p9 = pnand %p228_p8, %p225_p7 }
 0x1d3   :  { %233 = shalt.err (!%p230_p9)
}
 0x1d4   :  { %145 = dma.vmem_to_hbm [thread:$0]  %s143_s10, 16, %s307_s3, [#allocation4]  }
 0x1d5   :  { %238 = dma.done.wait [#allocation4], 16  }
 0x1d6   :  { %239 = vsyncadd [#allocation4], 4294967280 }
 0x1d7   :  { %149 = vsyncpa [#allocation3], 1 }
 0x1d8   :  { %150 = vsyncpa [#allocation6], 1 }
 0x1d9   :  { %151 = vsyncpa [#allocation4], 1 }

</bundles_post_ra>
